<compile_context>
chip_gen: v5e
topology: v5e:2x2
jax: 0.10.0
libtpu: 0.0.40
codegen_flags: <defaults>
</compile_context>

<pallas_src>
import functools

import jax
import jax.numpy as jnp
from jax import lax
from jax.experimental import pallas as pl
from jax.experimental.pallas import tpu as pltpu


def _conv_stats_kernel(xcol_ref, t_ref, s1_ref, s2_ref):
    """Phase 1: one lane-dense GEMM per row block + per-block BN partial sums.

    xcol_ref: (Rb, 3*W*Cin)      im2col'd activation rows (mxu dtype)
    t_ref   : (3*W*Cin, W*Cout)  Toeplitz-expanded conv weight (mxu dtype)
    s1_ref  : (1, 1, W*Cout)     per-block per-lane sum (f32)
    s2_ref  : (1, 1, W*Cout)     per-block per-lane sum of squares (f32)
    """
    y = jnp.dot(xcol_ref[...], t_ref[...], preferred_element_type=jnp.float32)
    # Sublane-only reduction (per-lane): no cross-lane work, unmasked 128-lane store.
    s1_ref[...] = jnp.sum(y, axis=0, keepdims=True)[None]
    s2_ref[...] = jnp.sum(y * y, axis=0, keepdims=True)[None]


def _conv_bn_relu_kernel(xcol_ref, t_ref, scale_ref, shift_ref, o_ref):
    """Phase 2: recompute the GEMM, apply folded BN (scale, shift), then ReLU.

    Recomputing the GEMM is cheaper than a store+reload of the f32 intermediate:
    the conv has only ~9 f32 FLOP per byte of that round trip (far below machine
    balance on v5e/v6e/v7x), so this phase is purely mem-bound on xcol + output.
    """
    y = jnp.dot(xcol_ref[...], t_ref[...], preferred_element_type=jnp.float32)
    o_ref[...] = jnp.maximum(
        y * scale_ref[...] + shift_ref[...], 0.0).astype(o_ref.dtype)


def _pick_block_rows(total_rows, target_rows):
    """Largest multiple-of-8 divisor of total_rows <= target_rows, preferring >=2
    grid steps (v7x megacore) when the problem size allows it."""
    if total_rows % 8 != 0:
        return total_rows                       # full-extent block is always legal
    cands = [r for r in range(8, min(target_rows, total_rows) + 1, 8)
             if total_rows % r == 0]
    if not cands:
        return total_rows
    best = cands[-1]
    if total_rows // best < 2:                  # give the 2nd TensorCore some work
        for r in reversed(cands):
            if total_rows // r >= 2:
                best = r
                break
    return best


@functools.partial(jax.jit, static_argnames=("mxu_dtype", "target_rows"))
def conv_batch_relu(x_nchw, w_oihw, gamma, beta, *,
                    mxu_dtype=jnp.bfloat16, target_rows=512):
    """x: (N, Cin, H, W) f32, w: (Cout, Cin, 3, 3) f32. Returns (N, Cout, H, W) f32."""
    N, Cin, H, W = x_nchw.shape
    Cout = w_oihw.shape[0]
    WCin, WCout = W * Cin, W * Cout
    K = 3 * WCin                                 # fused ky taps on the K axis
    eps = 1e-5

    # --- host glue: fused with the mandatory NCHW -> lane-dense relayout ----------
    # NCHW -> NHWC -> H-halo pad -> im2col along ky (K axis).  The W zero padding is
    # folded into the Toeplitz weight below, so the kernel never shifts along W.
    x_nhwc = jnp.transpose(x_nchw, (0, 2, 3, 1))               # (N, H, W, Cin)
    xp = jnp.pad(x_nhwc, ((0, 0), (1, 1), (0, 0), (0, 0)))     # (N, H+2, W, Cin)
    xp = xp.reshape(N, H + 2, WCin)
    xcol = jnp.concatenate(
        [xp[:, 0:H], xp[:, 1:H + 1], xp[:, 2:H + 2]], axis=-1)  # (N, H, 3*WCin)
    xcol = xcol.reshape(N * H, K).astype(mxu_dtype)

    # Toeplitz-expanded weight: T[(ky, w_in, ci), (w_out, co)] = W[ky, kx, ci, co]
    # with kx = w_in - w_out + 1, zero outside the 3-tap window / image border.
    # Built with exact elementwise ops (no matmul) so weights are not re-rounded.
    w_hwio = jnp.transpose(w_oihw, (2, 3, 1, 0)).astype(jnp.float32)  # (3,3,Cin,Cout)
    w_in = jnp.arange(W)[:, None]
    w_out = jnp.arange(W)[None, :]
    t = jnp.zeros((3, W, Cin, W, Cout), jnp.float32)
    for kx in range(3):
        sel = (w_in == w_out + kx - 1).astype(jnp.float32)            # (W_in, W_out)
        t = t + (sel[None, :, None, :, None]                          # (1,W,1,W,1)
                 * w_hwio[:, kx, :, :][:, None, :, None, :])          # (3,1,Cin,1,Cout)
    t = t.reshape(K, WCout).astype(mxu_dtype)
    # (Mosaic pads K=3*W*Cin up to the MXU tile internally; explicit padding to a
    #  multiple of 256 only pays once K is large enough to matter.)

    total_rows = N * H
    block_rows = _pick_block_rows(total_rows, target_rows)
    num_blocks = total_rows // block_rows

    # --- phase 1: conv GEMM + lane-dense per-block BN partial sums ----------------
    s1, s2 = pl.pallas_call(
        _conv_stats_kernel,
        out_shape=(
            jax.ShapeDtypeStruct((num_blocks, 1, WCout), jnp.float32),
            jax.ShapeDtypeStruct((num_blocks, 1, WCout), jnp.float32),
        ),
        grid=(num_blocks,),
        in_specs=[
            pl.BlockSpec((block_rows, K), lambda r: (r, 0)),
            pl.BlockSpec((K, WCout), lambda r: (0, 0)),   # constant index: copied once
        ],
        out_specs=(
            pl.BlockSpec((1, 1, WCout), lambda r: (r, 0, 0)),
            pl.BlockSpec((1, 1, WCout), lambda r: (r, 0, 0)),
        ),
        compiler_params=pltpu.CompilerParams(
            dimension_semantics=("parallel",)),
    )(xcol, t)

    # --- combine batch stats (tiny (Cout,)-sized math) and fold gamma/beta --------
    # One-pass var = E[y^2] - mean^2 in f32; fine for near-zero-mean conv outputs.
    count = jnp.float32(N * H * W)
    s1_c = jnp.sum(s1, axis=(0, 1)).reshape(W, Cout).sum(axis=0)       # (Cout,)
    s2_c = jnp.sum(s2, axis=(0, 1)).reshape(W, Cout).sum(axis=0)
    mean = s1_c / count
    var = jnp.maximum(s2_c / count - mean * mean, 0.0)
    scale = gamma.astype(jnp.float32) * lax.rsqrt(var + eps)
    shift = beta.astype(jnp.float32) - mean * scale
    scale_row = jnp.tile(scale, W)[None, :]                            # (1, W*Cout)
    shift_row = jnp.tile(shift, W)[None, :]

    # --- phase 2: recompute GEMM, normalize + ReLU, lane-dense output -------------
    out_flat = pl.pallas_call(
        _conv_bn_relu_kernel,
        out_shape=jax.ShapeDtypeStruct((total_rows, WCout), jnp.float32),
        grid=(num_blocks,),
        in_specs=[
            pl.BlockSpec((block_rows, K), lambda r: (r, 0)),
            pl.BlockSpec((K, WCout), lambda r: (0, 0)),
            pl.BlockSpec((1, WCout), lambda r: (0, 0)),
            pl.BlockSpec((1, WCout), lambda r: (0, 0)),
        ],
        out_specs=pl.BlockSpec((block_rows, WCout), lambda r: (r, 0)),
        compiler_params=pltpu.CompilerParams(
            dimension_semantics=("parallel",)),
    )(xcol, t, scale_row, shift_row)

    # lane-dense (N*H, W*Cout) -> NCHW to match the PyTorch module interface.
    return jnp.transpose(out_flat.reshape(N, H, W, Cout), (0, 3, 1, 2))


def _reference(x_nchw, w_oihw, gamma, beta):
    """Pure-JAX reference: same math as the PyTorch module in training mode."""
    y = lax.conv_general_dilated(
        x_nchw, w_oihw, window_strides=(1, 1), padding=((1, 1), (1, 1)),
        dimension_numbers=("NCHW", "OIHW", "NCHW"))
    mean = jnp.mean(y, axis=(0, 2, 3), keepdims=True)
    var = jnp.mean((y - mean) ** 2, axis=(0, 2, 3), keepdims=True)
    yhat = (y - mean) * lax.rsqrt(var + 1e-5)
    yhat = yhat * gamma.reshape(1, -1, 1, 1) + beta.reshape(1, -1, 1, 1)
    return jnp.maximum(yhat, 0.0)


if __name__ == "__main__":
    key = jax.random.PRNGKey(0)
    k_x, k_w = jax.random.split(key)

    # Small shapes consistent with ConvBatchRelu(in_planes=4, out_planes=8).
    N, Cin, H, W, Cout = 2, 4, 16, 16, 8

    x = jax.random.normal(k_x, (N, Cin, H, W), jnp.float32)
    fan_in = Cin * 3 * 3
    bound = (1.0 / fan_in) ** 0.5
    w = jax.random.uniform(k_w, (Cout, Cin, 3, 3), jnp.float32, -bound, bound)
    gamma = jnp.ones((Cout,), jnp.float32)     # BatchNorm2d default init
    beta = jnp.zeros((Cout,), jnp.float32)

    ref = _reference(x, w, gamma, beta)

    # Exact-semantics path (f32 MXU operands).
    out_f32 = jax.block_until_ready(
        conv_batch_relu(x, w, gamma, beta, mxu_dtype=jnp.float32))
    assert out_f32.shape == (N, Cout, H, W)
    assert jnp.allclose(out_f32, ref, atol=2e-3, rtol=2e-3)

    # Default fast path (bf16 MXU operands, f32 accumulation/stats).
    out_bf16 = jax.block_until_ready(conv_batch_relu(x, w, gamma, beta))
    assert out_bf16.shape == (N, Cout, H, W)
    assert jnp.allclose(out_bf16, ref, atol=5e-2, rtol=5e-2)

    print("KERNEL_OK")
</pallas_src>

<mosaic_0001>
module attributes {stable_mosaic.version = 11 : i64} {
  func.func @_conv_stats_kernel(%arg0: i32, %arg1: memref<16x192xf32, #tpu.memory_space<vmem>>, %arg2: memref<192x128xf32, #tpu.memory_space<vmem>>, %arg3: memref<1x1x128xf32, #tpu.memory_space<vmem>>, %arg4: memref<1x1x128xf32, #tpu.memory_space<vmem>>) attributes {dimension_semantics = [#tpu.dimension_semantics<parallel>], iteration_bounds = array<i64: 2>, scalar_prefetch = 0 : i64, scratch_operands = 0 : i64, tpu.core_type = #tpu.core_type<tc>, window_params = [{transform_indices = @transform_0, window_bounds = array<i64: 16, 192>}, {pipeline_mode = #tpu.pipeline_mode<synchronous>, transform_indices = @transform_1, window_bounds = array<i64: 192, 128>}, {transform_indices = @transform_2, window_bounds = array<i64: 1, 1, 128>}, {transform_indices = @transform_3, window_bounds = array<i64: 1, 1, 128>}]} {
    %c0 = arith.constant 0 : index
    %c0_0 = arith.constant 0 : index
    %0 = vector.load %arg1[%c0, %c0_0] : memref<16x192xf32, #tpu.memory_space<vmem>>, vector<16x192xf32>
    %c0_1 = arith.constant 0 : index
    %c0_2 = arith.constant 0 : index
    %1 = vector.load %arg2[%c0_1, %c0_2] : memref<192x128xf32, #tpu.memory_space<vmem>>, vector<192x128xf32>
    %cst = arith.constant dense<0.000000e+00> : vector<16x128xf32>
    %2 = tpu.matmul %0, %1, %cst {dimension_numbers = #tpu.dot_dimension_numbers<[1], [0], [0], [1], [0, 0, 1, 1], [], []>} : vector<16x192xf32>, vector<192x128xf32>, vector<16x128xf32> -> vector<16x128xf32>
    %cst_3 = arith.constant dense<0.000000e+00> : vector<128xf32>
    %3 = vector.multi_reduction <add>, %2, %cst_3 [0] : vector<16x128xf32> to vector<128xf32>
    %4 = vector.shape_cast %3 : vector<128xf32> to vector<1x128xf32>
    %5 = vector.shape_cast %4 : vector<1x128xf32> to vector<1x1x128xf32>
    %c0_4 = arith.constant 0 : index
    %c0_5 = arith.constant 0 : index
    %c0_6 = arith.constant 0 : index
    %6 = vector.load %arg3[%c0_4, %c0_5, %c0_6] : memref<1x1x128xf32, #tpu.memory_space<vmem>>, vector<1x1x128xf32>
    tpu.vector_store %arg3[%c0_4, %c0_5, %c0_6], %5 {strides = array<i32>} : memref<1x1x128xf32, #tpu.memory_space<vmem>>, vector<1x1x128xf32>,
    %7 = arith.mulf %2, %2 : vector<16x128xf32>
    %cst_7 = arith.constant dense<0.000000e+00> : vector<128xf32>
    %8 = vector.multi_reduction <add>, %7, %cst_7 [0] : vector<16x128xf32> to vector<128xf32>
    %9 = vector.shape_cast %8 : vector<128xf32> to vector<1x128xf32>
    %10 = vector.shape_cast %9 : vector<1x128xf32> to vector<1x1x128xf32>
    %c0_8 = arith.constant 0 : index
    %c0_9 = arith.constant 0 : index
    %c0_10 = arith.constant 0 : index
    %11 = vector.load %arg4[%c0_8, %c0_9, %c0_10] : memref<1x1x128xf32, #tpu.memory_space<vmem>>, vector<1x1x128xf32>
    tpu.vector_store %arg4[%c0_8, %c0_9, %c0_10], %10 {strides = array<i32>} : memref<1x1x128xf32, #tpu.memory_space<vmem>>, vector<1x1x128xf32>,
    return
  }
  func.func @transform_0(%arg0: i32) -> (i32, i32) {
    %c0_i32 = arith.constant 0 : i32
    %c0_i32_0 = arith.constant 0 : i32
    return %arg0, %c0_i32 : i32, i32
  }
  func.func @transform_1(%arg0: i32) -> (i32, i32) {
    %c0_i32 = arith.constant 0 : i32
    %c0_i32_0 = arith.constant 0 : i32
    %c0_i32_1 = arith.constant 0 : i32
    return %c0_i32, %c0_i32_0 : i32, i32
  }
  func.func @transform_2(%arg0: i32) -> (i32, i32, i32) {
    %c0_i32 = arith.constant 0 : i32
    %c0_i32_0 = arith.constant 0 : i32
    %c0_i32_1 = arith.constant 0 : i32
    return %arg0, %c0_i32, %c0_i32_0 : i32, i32, i32
  }
  func.func @transform_3(%arg0: i32) -> (i32, i32, i32) {
    %c0_i32 = arith.constant 0 : i32
    %c0_i32_0 = arith.constant 0 : i32
    %c0_i32_1 = arith.constant 0 : i32
    return %arg0, %c0_i32, %c0_i32_0 : i32, i32, i32
  }
}

module attributes {stable_mosaic.version = 11 : i64} {
  func.func @_conv_bn_relu_kernel(%arg0: i32, %arg1: memref<16x192xf32, #tpu.memory_space<vmem>>, %arg2: memref<192x128xf32, #tpu.memory_space<vmem>>, %arg3: memref<1x128xf32, #tpu.memory_space<vmem>>, %arg4: memref<1x128xf32, #tpu.memory_space<vmem>>, %arg5: memref<16x128xf32, #tpu.memory_space<vmem>>) attributes {dimension_semantics = [#tpu.dimension_semantics<parallel>], iteration_bounds = array<i64: 2>, scalar_prefetch = 0 : i64, scratch_operands = 0 : i64, tpu.core_type = #tpu.core_type<tc>, window_params = [{transform_indices = @transform_0, window_bounds = array<i64: 16, 192>}, {pipeline_mode = #tpu.pipeline_mode<synchronous>, transform_indices = @transform_1, window_bounds = array<i64: 192, 128>}, {pipeline_mode = #tpu.pipeline_mode<synchronous>, transform_indices = @transform_2, window_bounds = array<i64: 1, 128>}, {pipeline_mode = #tpu.pipeline_mode<synchronous>, transform_indices = @transform_3, window_bounds = array<i64: 1, 128>}, {transform_indices = @transform_4, window_bounds = array<i64: 16, 128>}]} {
    %c0 = arith.constant 0 : index
    %c0_0 = arith.constant 0 : index
    %0 = vector.load %arg1[%c0, %c0_0] : memref<16x192xf32, #tpu.memory_space<vmem>>, vector<16x192xf32>
    %c0_1 = arith.constant 0 : index
    %c0_2 = arith.constant 0 : index
    %1 = vector.load %arg2[%c0_1, %c0_2] : memref<192x128xf32, #tpu.memory_space<vmem>>, vector<192x128xf32>
    %cst = arith.constant dense<0.000000e+00> : vector<16x128xf32>
    %2 = tpu.matmul %0, %1, %cst {dimension_numbers = #tpu.dot_dimension_numbers<[1], [0], [0], [1], [0, 0, 1, 1], [], []>} : vector<16x192xf32>, vector<192x128xf32>, vector<16x128xf32> -> vector<16x128xf32>
    %c0_3 = arith.constant 0 : index
    %c0_4 = arith.constant 0 : index
    %3 = vector.load %arg3[%c0_3, %c0_4] : memref<1x128xf32, #tpu.memory_space<vmem>>, vector<1x128xf32>
    %4 = vector.broadcast %3 : vector<1x128xf32> to vector<16x128xf32>
    %5 = arith.mulf %2, %4 : vector<16x128xf32>
    %c0_5 = arith.constant 0 : index
    %c0_6 = arith.constant 0 : index
    %6 = vector.load %arg4[%c0_5, %c0_6] : memref<1x128xf32, #tpu.memory_space<vmem>>, vector<1x128xf32>
    %7 = vector.broadcast %6 : vector<1x128xf32> to vector<16x128xf32>
    %8 = arith.addf %5, %7 : vector<16x128xf32>
    %cst_7 = arith.constant 0.000000e+00 : f32
    %9 = vector.broadcast %cst_7 : f32 to vector<16x128xf32>
    %10 = arith.maximumf %8, %9 : vector<16x128xf32>
    %c0_8 = arith.constant 0 : index
    %c0_9 = arith.constant 0 : index
    %11 = vector.load %arg5[%c0_8, %c0_9] : memref<16x128xf32, #tpu.memory_space<vmem>>, vector<16x128xf32>
    tpu.vector_store %arg5[%c0_8, %c0_9], %10 {strides = array<i32>} : memref<16x128xf32, #tpu.memory_space<vmem>>, vector<16x128xf32>,
    return
  }
  func.func @transform_0(%arg0: i32) -> (i32, i32) {
    %c0_i32 = arith.constant 0 : i32
    %c0_i32_0 = arith.constant 0 : i32
    return %arg0, %c0_i32 : i32, i32
  }
  func.func @transform_1(%arg0: i32) -> (i32, i32) {
    %c0_i32 = arith.constant 0 : i32
    %c0_i32_0 = arith.constant 0 : i32
    %c0_i32_1 = arith.constant 0 : i32
    return %c0_i32, %c0_i32_0 : i32, i32
  }
  func.func @transform_2(%arg0: i32) -> (i32, i32) {
    %c0_i32 = arith.constant 0 : i32
    %c0_i32_0 = arith.constant 0 : i32
    %c0_i32_1 = arith.constant 0 : i32
    return %c0_i32, %c0_i32_0 : i32, i32
  }
  func.func @transform_3(%arg0: i32) -> (i32, i32) {
    %c0_i32 = arith.constant 0 : i32
    %c0_i32_0 = arith.constant 0 : i32
    %c0_i32_1 = arith.constant 0 : i32
    return %c0_i32, %c0_i32_0 : i32, i32
  }
  func.func @transform_4(%arg0: i32) -> (i32, i32) {
    %c0_i32 = arith.constant 0 : i32
    %c0_i32_0 = arith.constant 0 : i32
    return %arg0, %c0_i32 : i32, i32
  }
}

</mosaic_0001>

<bundles_post_ra>
// kernel: tile.13
= control target key start
LH: loop header
LB: loop body
LE: loop exit
PB: predicated region body
PF: predicated region fallthrough
CT: control target
= control target key end

     0   :  { %s28_s0 = inlined_call_operand.vmem [shape: f32[8], index: 0, kind: input, shape index: {}]   ;;  %s29_s1 = inlined_call_operand.vmem [shape: f32[16,8], index: 1, kind: output, shape index: {}]  }
   0x1   :  { %v4_v0 = vld [vmem:[%s28_s0] ss:$0 sm:$0xff] }
   0x2   :  { %5 = vst [vmem:[%s29_s1] sm:$0xff] %v4_v0 }
   0x3   :  { %8 = vst [vmem:[%s29_s1 + $0x8] sm:$0xff] %v4_v0 }

// kernel: tile.14
= control target key start
LH: loop header
LB: loop body
LE: loop exit
PB: predicated region body
PF: predicated region fallthrough
CT: control target
= control target key end

     0   :  { %s131_s10 = smov 120   ;;  %s132_s11 = smov 104   ;;  %vm3_vm0 = vcmask 64512   ;;  %vm9_vm1 = vcmask 1048512   ;;  %vm15_vm2 = vcmask 982912   ;;  %vm21_vm3 = vcmask 917312   ;;  %s207_s0 = inlined_call_operand.vmem [shape: f32[16,8], index: 0, kind: input, shape index: {}]   ;;  %s208_s1 = inlined_call_operand.vmem [shape: f32[1,128], index: 1, kind: output, shape index: {}]  }
   0x1   :  { %v101_v0 = vld [vmem:[%s207_s0 + $0xf] sm:$0x1]   ;;  %v103_v1 = vld [vmem:[%s207_s0 + $0xd] sm:$0x1]   ;;  %v105_v2 = vld [vmem:[%s207_s0 + $0xb] sm:$0x1]  }
   0x2   :  { %7 = vrot.lane.b32.xlu0 %v101_v0, %s131_s10  ;;  %19 = vrot.lane.b32.xlu1 %v103_v1, %s132_s11  ;;  %s133_s14 = smov 88   ;;  %v102_v3 = vld [vmem:[%s207_s0 + $0xe] sm:$0x1]   ;;  %v104_v4 = vld [vmem:[%s207_s0 + $0xc] sm:$0x1]   ;;  %s134_s19 = smov 112  }
   0x3   :  { %31 = vrot.lane.b32.xlu2 %v105_v2, %s133_s14  ;;  %s135_s20 = smov 96   ;;  %v106_v5 = vld [vmem:[%s207_s0 + $0xa] sm:$0x1]   ;;  %s136_s23 = smov 80   ;;  %v107_v6 = vld [vmem:[%s207_s0 + $0x9] sm:$0x1]  }
   0x4   :  { %v108_v7 = vld [vmem:[%s207_s0 + $0x8] sm:$0x1]   ;;  %s137_s28 = smov 72   ;;  %s138_s29 = smov 64   ;;  %v109_v8 = vld [vmem:[%s207_s0 + $0x7] sm:$0x1]  }
   0x5   :  { %s139_s3 = smov 56   ;;  %v110_v9 = vld [vmem:[%s207_s0 + $0x6] sm:$0x1]   ;;  %v111_v10 = vld [vmem:[%s207_s0 + $0x5] sm:$0x1]   ;;  %s140_s8 = smov 48  }
   0x6   :  { %s141_s9 = smov 40   ;;  %v112_v11 = vld [vmem:[%s207_s0 + $0x4] sm:$0x1]   ;;  %s142_s12 = smov 32   ;;  %v113_v12 = vld [vmem:[%s207_s0 + $0x3] sm:$0x1]  }
   0x7   :  { %v114_v13 = vld [vmem:[%s207_s0 + $0x2] sm:$0x1]   ;;  %s143_s17 = smov 24   ;;  %s144_s18 = smov 16   ;;  %v115_v14 = vld [vmem:[%s207_s0 + $0x1] sm:$0x1]  }
   0x8   :  { %s145_s21 = smov 8   ;;  %v2_v15 = vld [vmem:[%s207_s0] sm:$0x1]   ;;  %vm27_vm4 = vcmask 851712   ;;  %vm33_vm5 = vcmask 786112   ;;  %vm39_vm6 = vcmask 720512  }
   0x9   :  { %4 = vst.msk [vmem:[#allocation0] sm:$0x1] %vm3_vm0, %v2_v15   ;;  %vm45_vm7 = vcmask 654912   ;;  %vm51_vm8 = vcmask 589312   ;;  %vm57_vm9 = vcmask 523712   ;;  %vm63_vm10 = vcmask 458112  }
   0xa   :  { %13 = vrot.lane.b32.xlu0 %v102_v3, %s134_s19  ;;  %25 = vrot.lane.b32.xlu1 %v104_v4, %s135_s20  ;;  %vm69_vm11 = vcmask 392512   ;;  %vm75_vm12 = vcmask 326912   ;;  %vm81_vm13 = vcmask 261312   ;;  %vm87_vm14 = vcmask 195712  }
   0xb   :  { %37 = vrot.lane.b32.xlu2 %v106_v5, %s136_s23  ;;  %vm93_vm15 = vcmask 130112  }
  0x12   :  { %43 = vrot.lane.b32.xlu0 %v107_v6, %s137_s28  ;;  %49 = vrot.lane.b32.xlu1 %v108_v7, %s138_s29 }
  0x13   :  { %55 = vrot.lane.b32.xlu2 %v109_v8, %s139_s3 }
  0x1a   :  { %61 = vrot.lane.b32.xlu0 %v110_v9, %s140_s8  ;;  %67 = vrot.lane.b32.xlu1 %v111_v10, %s141_s9 }
  0x1b   :  { %73 = vrot.lane.b32.xlu2 %v112_v11, %s142_s12 }
  0x22   :  { %79 = vrot.lane.b32.xlu0 %v113_v12, %s143_s17  ;;  %85 = vrot.lane.b32.xlu1 %v114_v13, %s144_s18 }
  0x23   :  { %91 = vrot.lane.b32.xlu2 %v115_v14, %s145_s21 }
  0x5d   :  { %v32_v16 = vpop.permute.xlu2 %31  }
  0x65   :  { %v38_v17 = vpop.permute.xlu2 %37  }
  0x6d   :  { %v56_v18 = vpop.permute.xlu2 %55  }
  0x74   :  { %v8_v19 = vpop.permute.xlu0 %7   ;;  %v20_v20 = vpop.permute.xlu1 %19  }
  0x75   :  { %10 = vst.msk [vmem:[#allocation0] sm:$0x1] %vm9_vm1, %v8_v19   ;;  %v74_v21 = vpop.permute.xlu2 %73  }
  0x7c   :  { %v14_v22 = vpop.permute.xlu0 %13   ;;  %v26_v23 = vpop.permute.xlu1 %25  }
  0x7d   :  { %16 = vst.msk [vmem:[#allocation0] sm:$0x1] %vm15_vm2, %v14_v22   ;;  %v92_v24 = vpop.permute.xlu2 %91  }
  0x7e   :  { %22 = vst.msk [vmem:[#allocation0] sm:$0x1] %vm21_vm3, %v20_v20  }
  0x7f   :  { %28 = vst.msk [vmem:[#allocation0] sm:$0x1] %vm27_vm4, %v26_v23  }
  0x80   :  { %34 = vst.msk [vmem:[#allocation0] sm:$0x1] %vm33_vm5, %v32_v16  }
  0x81   :  { %40 = vst.msk [vmem:[#allocation0] sm:$0x1] %vm39_vm6, %v38_v17  }
  0x84   :  { %v44_v25 = vpop.permute.xlu0 %43   ;;  %v50_v26 = vpop.permute.xlu1 %49  }
  0x85   :  { %46 = vst.msk [vmem:[#allocation0] sm:$0x1] %vm45_vm7, %v44_v25  }
  0x86   :  { %52 = vst.msk [vmem:[#allocation0] sm:$0x1] %vm51_vm8, %v50_v26  }
  0x87   :  { %58 = vst.msk [vmem:[#allocation0] sm:$0x1] %vm57_vm9, %v56_v18  }
  0x8c   :  { %v62_v27 = vpop.permute.xlu0 %61   ;;  %v68_v28 = vpop.permute.xlu1 %67  }
  0x8d   :  { %64 = vst.msk [vmem:[#allocation0] sm:$0x1] %vm63_vm10, %v62_v27  }
  0x8e   :  { %70 = vst.msk [vmem:[#allocation0] sm:$0x1] %vm69_vm11, %v68_v28  }
  0x8f   :  { %76 = vst.msk [vmem:[#allocation0] sm:$0x1] %vm75_vm12, %v74_v21  }
  0x94   :  { %v80_v29 = vpop.permute.xlu0 %79   ;;  %v86_v30 = vpop.permute.xlu1 %85  }
  0x95   :  { %82 = vst.msk [vmem:[#allocation0] sm:$0x1] %vm81_vm13, %v80_v29  }
  0x96   :  { %88 = vst.msk [vmem:[#allocation0] sm:$0x1] %vm87_vm14, %v86_v30  }
  0x97   :  { %94 = vst.msk [vmem:[#allocation0] sm:$0x1] %vm93_vm15, %v92_v24  }
  0x9e   :  { %v97_v31 = vld [vmem:[#allocation0] sm:$0x1] }
  0x9f   :  { %100 = vst [vmem:[%s208_s1] sm:$0x1] %v97_v31 }

// kernel: conv_batch_relu.2
= control target key start
LH: loop header
LB: loop body
LE: loop exit
PB: predicated region body
PF: predicated region fallthrough
CT: control target
= control target key end

     0   :  { %s417_s12 = smov 0   ;;  %s522_s0 = inlined_call_operand.vmem [shape: f32[32,192], index: 0, kind: input, shape index: {}]   ;;  %s523_s1 = inlined_call_operand.vmem [shape: f32[192,128], index: 1, kind: input, shape index: {}]   ;;  %s524_s2 = inlined_call_operand.vmem [shape: f32[2,1,128], index: 2, kind: output, shape index: {0}]   ;;  %s525_s3 = inlined_call_operand.vmem [shape: f32[2,1,128], index: 3, kind: output, shape index: {1}]  }
   0x1 LB: > { %s423_s13 = sadd.s32 4294967295, %s395_s12   ;;  %p356_p0 = scmp.ge.s32.totalorder %s395_s12, 1  ;;  %s395_s12 = sphi %s417_s12, %s14_s12  }
   0x2   : > { %p142_p1 = scmp.lt.s32.totalorder %s395_s12, 3 }
   0x4   : > { %p143_p2 = pnand %p356_p0, %p142_p1 }
   0x5   : > { %s357_s18 = sshll.u32 (!%p143_p2), %s423_s13, 1  ;;  %p175_p4 = scmp.lt.s32.totalorder (!%p143_p2), %s423_s13, 1 }
   0x6   : > { %146 = sbr.rel (%p143_p2) target bundleno = 194 (0xc2), region = 28  ;;  %p169_p3 = scmp.lt.s32.totalorder (!%p143_p2), %s357_s18, 3 }
   0xb   : > { %v200_v0 = vld [vmem:[%s523_s1 + $0x78] sm:$0xff]  ;;  %v199_v1 = vld [vmem:[%s523_s1 + $0x70] sm:$0xff]  ;;  %v198_v2 = vld [vmem:[%s523_s1 + $0x68] sm:$0xff]  ;;  %s527_s18 = smov (!%p169_p3, %s357_s18), 3  ;;  %vm209_vm0 = vcmask 523264   ;;  %s529_s13 = smov (!%p175_p4, %s423_s13), 1 }
   0xc   : > { %216 = vmatpush.msra.mxu0 %v200_v0  ;;  %365 = vmatpush.msra.mxu2 %v200_v0  ;;  %v208_v3 = vld [vmem:[%s523_s1 + $0xb8] sm:$0xff]  ;;  %v207_v4 = vld [vmem:[%s523_s1 + $0xb0] sm:$0xff]  ;;  %v197_v5 = vld [vmem:[%s523_s1 + $0x60] sm:$0xff]  ;;  %s364_s16 = sshll.u32 %s527_s18, 4  ;;  %s177_s20 = scalar_lea.vmem %s524_s2, %s529_s13 }
   0xd   : > { %247 = vmatpush.msra.mxu1 %v208_v3  ;;  %v206_v6 = vld [vmem:[%s523_s1 + $0xa8] sm:$0xff]  ;;  %v196_v7 = vld [vmem:[%s523_s1 + $0x58] sm:$0xff]  ;;  %v205_v8 = vld [vmem:[%s523_s1 + $0xa0] sm:$0xff]  ;;  %s479_s18 = scalar_lea.vmem %s522_s0, %s364_s16  ;;  %s180_s23 = scalar_lea.vmem %s525_s3, %s529_s13 }
   0xe   : > { %217 = vmatpush.msra.mxu0 %v199_v1  ;;  %366 = vmatpush.msra.mxu2 %v199_v1  ;;  %v195_v9 = vld [vmem:[%s523_s1 + $0x50] sm:$0xff]  ;;  %v204_v10 = vld [vmem:[%s523_s1 + $0x98] sm:$0xff]  ;;  %v194_v11 = vld [vmem:[%s523_s1 + $0x48] sm:$0xff] }
   0xf   : > { %248 = vmatpush.msra.mxu1 %v207_v4  ;;  %v203_v12 = vld [vmem:[%s523_s1 + $0x90] sm:$0xff]  ;;  %v193_v13 = vld [vmem:[%s523_s1 + $0x40] sm:$0xff]  ;;  %v202_v14 = vld [vmem:[%s523_s1 + $0x88] sm:$0xff] }
  0x10   : > { %218 = vmatpush.msra.mxu0 %v198_v2  ;;  %367 = vmatpush.msra.mxu2 %v198_v2  ;;  %v192_v15 = vld [vmem:[%s523_s1 + $0x38] sm:$0xff]  ;;  %v201_v16 = vld [vmem:[%s523_s1 + $0x80] sm:$0xff]  ;;  %v191_v17 = vld [vmem:[%s523_s1 + $0x30] sm:$0xff] }
  0x11   : > { %249 = vmatpush.msra.mxu1 %v206_v6  ;;  %v182_v18 = vld [vmem:[%s479_s18 + $0x8] sm:$0xff]  ;;  %v189_v20 = vld [vmem:[%s523_s1 + $0x20] sm:$0xff]  ;;  %v188_v21 = vld [vmem:[%s523_s1 + $0x18] sm:$0xff] }
  0x12   : > { %219 = vmatpush.msra.mxu0 %v197_v5  ;;  %368 = vmatpush.msra.mxu2 %v197_v5  ;;  %v190_v19 = vld [vmem:[%s523_s1 + $0x28] sm:$0xff]  ;;  %v187_v22 = vld [vmem:[%s523_s1 + $0x10] sm:$0xff]  ;;  %v184_v23 = vld [vmem:[%s479_s18 + $0x18] sm:$0xff] }
  0x13   : > { %250 = vmatpush.msra.mxu1 %v205_v8  ;;  %v186_v24 = vld [vmem:[%s523_s1 + $0x8] sm:$0xff]  ;;  %v185_v25 = vld [vmem:[%s523_s1] sm:$0xff]  ;;  %v183_v27 = vld [vmem:[%s479_s18 + $0x10] sm:$0xff] }
  0x14   : > { %220 = vmatpush.msra.mxu0 %v196_v7  ;;  %369 = vmatpush.msra.mxu2 %v196_v7  ;;  %v181_v26 = vld [vmem:[%s479_s18] sm:$0xff] }
  0x15   : > { %251 = vmatpush.msra.mxu1 %v204_v10 }
  0x16   : > { %221 = vmatpush.msra.mxu0 %v195_v9  ;;  %370 = vmatpush.msra.mxu2 %v195_v9 }
  0x17   : > { %252 = vmatpush.msra.mxu1 %v203_v12 }
  0x18   : > { %222 = vmatpush.msra.mxu0 %v194_v11  ;;  %371 = vmatpush.msra.mxu2 %v194_v11 }
  0x19   : > { %253 = vmatpush.msra.mxu1 %v202_v14 }
  0x1a   : > { %223 = vmatpush.msra.mxu0 %v193_v13  ;;  %372 = vmatpush.msra.mxu2 %v193_v13 }
  0x1b   : > { %254 = vmatpush.msra.mxu1 %v201_v16 }
  0x1c   : > { %224 = vmatpush.msra.mxu0 %v192_v15  ;;  %373 = vmatpush.msra.mxu2 %v192_v15 }
  0x1d   : > { %360 = vmatmul.msk.f32.vlgmr.msra.gmra.mxu1 %vm209_vm0, %v182_v18 }
  0x1e   : > { %225 = vmatpush.msra.mxu0 %v191_v17  ;;  %374 = vmatpush.msra.mxu2 %v191_v17 }
  0x20   : > { %226 = vmatpush.msra.mxu0 %v190_v19  ;;  %375 = vmatpush.msra.mxu2 %v190_v19 }
  0x22   : > { %227 = vmatpush.msra.mxu0 %v189_v20  ;;  %376 = vmatpush.msra.mxu2 %v189_v20 }
  0x24   : > { %228 = vmatpush.msra.mxu0 %v188_v21  ;;  %377 = vmatpush.msra.mxu2 %v188_v21 }
  0x25   : > { %361 = vmatmul.msk.f32.gmra.mxu1 %vm209_vm0, %v184_v23 }
  0x26   : > { %229 = vmatpush.msra.mxu0 %v187_v22  ;;  %378 = vmatpush.msra.mxu2 %v187_v22 }
  0x28   : > { %230 = vmatpush.msra.mxu0 %v186_v24  ;;  %379 = vmatpush.msra.mxu2 %v186_v24 }
  0x2a   : > { %231 = vmatpush.msra.mxu0 %v185_v25  ;;  %380 = vmatpush.msra.mxu2 %v185_v25 }
  0x2b   : > { %232 = vmatmul.f32.vlgmr.msra.gmra.mxu0 %v181_v26  ;;  %235 = vmatmul.f32.vlgmr.msra.gmra.mxu2 %v183_v27 }
  0x9a   : > { %v256_v28 = vpop.f32.mrf.mxu1 }
  0xa2   : > { %v259_v30 = vpop.f32.mrf.mxu1 }
  0xa8   : > { %v233_v29 = vpop.f32.mrf.mxu0 }
  0xa9   : > { %v257_v31 = vadd.f32 %v256_v28, %v233_v29 }
  0xab   : > { %v270_v34 = vmul.f32 %v257_v31, %v257_v31 }
  0xae   : > { %v236_v32 = vpop.f32.mrf.mxu2 }
  0xaf   : > { %v260_v33 = vadd.f32 %v259_v30, %v236_v32 }
  0xb1   : > { %v262_v35 = vadd.f32 %v260_v33, %v257_v31  ;;  %v271_v36 = vmul.f32 %v260_v33, %v260_v33 }
  0xb3   : > { %v263_v37 = vrot.slane %v262_v35, 4  ;;  %v272_v38 = vadd.f32 %v271_v36, %v270_v34 }
  0xb5   : > { %v264_v39 = vadd.f32 %v263_v37, %v262_v35  ;;  %v273_v40 = vrot.slane %v272_v38, 4 }
  0xb7   : > { %v265_v41 = vrot.slane %v264_v39, 2  ;;  %v274_v42 = vadd.f32 %v273_v40, %v272_v38 }
  0xb9   : > { %v266_v43 = vadd.f32 %v265_v41, %v264_v39  ;;  %v275_v44 = vrot.slane %v274_v42, 2 }
  0xbb   : > { %v267_v45 = vrot.slane %v266_v43, 1  ;;  %v276_v46 = vadd.f32 %v275_v44, %v274_v42 }
  0xbd   : > { %v268_v47 = vadd.f32 %v267_v45, %v266_v43  ;;  %v277_v48 = vrot.slane %v276_v46, 1 }
  0xbf   : > { %269 = vst [vmem:[%s177_s20] sm:$0x1] %v268_v47  ;;  %v278_v49 = vadd.f32 %v277_v48, %v276_v46 }
  0xc1   : > { %279 = vst [vmem:[%s180_s23] sm:$0x1] %v278_v49 }
  0xc2 PF: > { %s14_s12 = sadd.s32 1, %s395_s12  }
  0xc3   : > { %p11_p5 = scmp.ge.s32.totalorder %s14_s12, 4  }
  0xc5   :  { %13 = sbr.rel (!%p11_p5) target bundleno = 1 (0x1), region = 70 }

// kernel: conv_batch_relu.3
= control target key start
LH: loop header
LB: loop body
LE: loop exit
PB: predicated region body
PF: predicated region fallthrough
CT: control target
= control target key end

     0   :  { %s431_s15 = smov 0   ;;  %s538_s0 = inlined_call_operand.vmem [shape: f32[32,192], index: 0, kind: input, shape index: {}]   ;;  %s539_s1 = inlined_call_operand.vmem [shape: f32[192,128], index: 1, kind: input, shape index: {}]   ;;  %s540_s2 = inlined_call_operand.vmem [shape: f32[1,128], index: 2, kind: input, shape index: {}]   ;;  %s541_s3 = inlined_call_operand.vmem [shape: f32[1,128], index: 3, kind: input, shape index: {}]   ;;  %s542_s4 = inlined_call_operand.vmem [shape: f32[32,128], index: 4, kind: output, shape index: {}]  }
   0x1 LB: > { %s357_s16 = sadd.s32 4294967295, %s404_s15   ;;  %p361_p0 = scmp.ge.s32.totalorder %s404_s15, 1  ;;  %s404_s15 = sphi %s431_s15, %s14_s15  }
   0x2   : > { %p164_p1 = scmp.lt.s32.totalorder %s404_s15, 3 }
   0x4   : > { %p165_p2 = pnand %p361_p0, %p164_p1 }
   0x5   : > { %s362_s21 = sshll.u32 (!%p165_p2), %s357_s16, 1 }
   0x6   : > { %168 = sbr.rel (%p165_p2) target bundleno = 184 (0xb8), region = 36  ;;  %p192_p3 = scmp.lt.s32.totalorder (!%p165_p2), %s362_s21, 3 }
   0xb   : > { %v223_v0 = vld [vmem:[%s539_s1 + $0x78] sm:$0xff]  ;;  %v222_v1 = vld [vmem:[%s539_s1 + $0x70] sm:$0xff]  ;;  %v221_v2 = vld [vmem:[%s539_s1 + $0x68] sm:$0xff]  ;;  %s544_s21 = smov (!%p192_p3, %s362_s21), 3  ;;  %vm232_vm0 = vcmask 523264  }
   0xc   : > { %239 = vmatpush.msra.mxu0 %v223_v0  ;;  %372 = vmatpush.msra.mxu2 %v223_v0  ;;  %v231_v3 = vld [vmem:[%s539_s1 + $0xb8] sm:$0xff]  ;;  %v230_v4 = vld [vmem:[%s539_s1 + $0xb0] sm:$0xff]  ;;  %v220_v5 = vld [vmem:[%s539_s1 + $0x60] sm:$0xff]  ;;  %s371_s19 = sshll.u32 %s544_s21, 4  ;;  %s366_s26 = sshll.u32 %s544_s21, 3 }
   0xd   : > { %270 = vmatpush.msra.mxu1 %v231_v3  ;;  %v229_v6 = vld [vmem:[%s539_s1 + $0xa8] sm:$0xff]  ;;  %v219_v7 = vld [vmem:[%s539_s1 + $0x58] sm:$0xff]  ;;  %v228_v8 = vld [vmem:[%s539_s1 + $0xa0] sm:$0xff]  ;;  %s493_s29 = scalar_lea.vmem %s538_s0, %s371_s19 }
   0xe   : > { %240 = vmatpush.msra.mxu0 %v222_v1  ;;  %373 = vmatpush.msra.mxu2 %v222_v1  ;;  %v218_v9 = vld [vmem:[%s539_s1 + $0x50] sm:$0xff]  ;;  %v227_v10 = vld [vmem:[%s539_s1 + $0x98] sm:$0xff]  ;;  %v217_v11 = vld [vmem:[%s539_s1 + $0x48] sm:$0xff] }
   0xf   : > { %271 = vmatpush.msra.mxu1 %v230_v4  ;;  %v226_v12 = vld [vmem:[%s539_s1 + $0x90] sm:$0xff]  ;;  %v216_v13 = vld [vmem:[%s539_s1 + $0x40] sm:$0xff]  ;;  %v225_v14 = vld [vmem:[%s539_s1 + $0x88] sm:$0xff] }
  0x10   : > { %241 = vmatpush.msra.mxu0 %v221_v2  ;;  %374 = vmatpush.msra.mxu2 %v221_v2  ;;  %v215_v15 = vld [vmem:[%s539_s1 + $0x38] sm:$0xff]  ;;  %v224_v16 = vld [vmem:[%s539_s1 + $0x80] sm:$0xff]  ;;  %v214_v17 = vld [vmem:[%s539_s1 + $0x30] sm:$0xff] }
  0x11   : > { %272 = vmatpush.msra.mxu1 %v229_v6  ;;  %v205_v18 = vld [vmem:[%s493_s29 + $0x8] sm:$0xff]  ;;  %v212_v20 = vld [vmem:[%s539_s1 + $0x20] sm:$0xff]  ;;  %v211_v21 = vld [vmem:[%s539_s1 + $0x18] sm:$0xff] }
  0x12   : > { %242 = vmatpush.msra.mxu0 %v220_v5  ;;  %375 = vmatpush.msra.mxu2 %v220_v5  ;;  %v213_v19 = vld [vmem:[%s539_s1 + $0x28] sm:$0xff]  ;;  %v210_v22 = vld [vmem:[%s539_s1 + $0x10] sm:$0xff]  ;;  %v207_v23 = vld [vmem:[%s493_s29 + $0x18] sm:$0xff] }
  0x13   : > { %273 = vmatpush.msra.mxu1 %v228_v8  ;;  %v209_v24 = vld [vmem:[%s539_s1 + $0x8] sm:$0xff]  ;;  %v208_v25 = vld [vmem:[%s539_s1] sm:$0xff]  ;;  %v206_v27 = vld [vmem:[%s493_s29 + $0x10] sm:$0xff] }
  0x14   : > { %243 = vmatpush.msra.mxu0 %v219_v7  ;;  %376 = vmatpush.msra.mxu2 %v219_v7  ;;  %v204_v26 = vld [vmem:[%s493_s29] sm:$0xff]  ;;  %s202_s29 = scalar_lea.vmem %s542_s4, %s366_s26 }
  0x15   : > { %274 = vmatpush.msra.mxu1 %v227_v10  ;;  %v396_v29 = vld [vmem:[%s540_s2] ss:$0 sm:$0xff] }
  0x16   : > { %244 = vmatpush.msra.mxu0 %v218_v9  ;;  %377 = vmatpush.msra.mxu2 %v218_v9  ;;  %v397_v32 = vld [vmem:[%s541_s3] ss:$0 sm:$0xff] }
  0x17   : > { %275 = vmatpush.msra.mxu1 %v226_v12 }
  0x18   : > { %245 = vmatpush.msra.mxu0 %v217_v11  ;;  %378 = vmatpush.msra.mxu2 %v217_v11 }
  0x19   : > { %276 = vmatpush.msra.mxu1 %v225_v14 }
  0x1a   : > { %246 = vmatpush.msra.mxu0 %v216_v13  ;;  %379 = vmatpush.msra.mxu2 %v216_v13 }
  0x1b   : > { %277 = vmatpush.msra.mxu1 %v224_v16 }
  0x1c   : > { %247 = vmatpush.msra.mxu0 %v215_v15  ;;  %380 = vmatpush.msra.mxu2 %v215_v15 }
  0x1d   : > { %367 = vmatmul.msk.f32.vlgmr.msra.gmra.mxu1 %vm232_vm0, %v205_v18 }
  0x1e   : > { %248 = vmatpush.msra.mxu0 %v214_v17  ;;  %381 = vmatpush.msra.mxu2 %v214_v17 }
  0x20   : > { %249 = vmatpush.msra.mxu0 %v213_v19  ;;  %382 = vmatpush.msra.mxu2 %v213_v19 }
  0x22   : > { %250 = vmatpush.msra.mxu0 %v212_v20  ;;  %383 = vmatpush.msra.mxu2 %v212_v20 }
  0x24   : > { %251 = vmatpush.msra.mxu0 %v211_v21  ;;  %384 = vmatpush.msra.mxu2 %v211_v21 }
  0x25   : > { %368 = vmatmul.msk.f32.gmra.mxu1 %vm232_vm0, %v207_v23 }
  0x26   : > { %252 = vmatpush.msra.mxu0 %v210_v22  ;;  %385 = vmatpush.msra.mxu2 %v210_v22 }
  0x28   : > { %253 = vmatpush.msra.mxu0 %v209_v24  ;;  %386 = vmatpush.msra.mxu2 %v209_v24 }
  0x2a   : > { %254 = vmatpush.msra.mxu0 %v208_v25  ;;  %387 = vmatpush.msra.mxu2 %v208_v25 }
  0x2b   : > { %255 = vmatmul.f32.vlgmr.msra.gmra.mxu0 %v204_v26  ;;  %258 = vmatmul.f32.vlgmr.msra.gmra.mxu2 %v206_v27 }
  0x9a   : > { %v279_v28 = vpop.f32.mrf.mxu1 }
  0xa2   : > { %v282_v34 = vpop.f32.mrf.mxu1 }
  0xa8   : > { %v256_v30 = vpop.f32.mrf.mxu0 }
  0xa9   : > { %v280_v31 = vadd.f32 %v279_v28, %v256_v30 }
  0xab   : > { %v289_v33 = vmul.f32 %v396_v29, %v280_v31 }
  0xad   : > { %v295_v35 = vadd.f32 %v397_v32, %v289_v33 }
  0xae   : > { %v259_v36 = vpop.f32.mrf.mxu2 }
  0xaf   : > { %v297_v37 = vmax.f32 %v295_v35, 0.0  ;;  %v283_v38 = vadd.f32 %v282_v34, %v259_v36 }
  0xb1   : > { %299 = vst [vmem:[%s202_s29] sm:$0xff] %v297_v37  ;;  %v290_v39 = vmul.f32 %v396_v29, %v283_v38 }
  0xb3   : > { %v296_v40 = vadd.f32 %v397_v32, %v290_v39 }
  0xb5   : > { %v298_v41 = vmax.f32 %v296_v40, 0.0 }
  0xb7   : > { %300 = vst [vmem:[%s202_s29 + $0x8] sm:$0xff] %v298_v41 }
  0xb8 PF: > { %s14_s15 = sadd.s32 1, %s404_s15  }
  0xb9   : > { %p11_p4 = scmp.ge.s32.totalorder %s14_s15, 4  }
  0xbb   :  { %13 = sbr.rel (!%p11_p4) target bundleno = 1 (0x1), region = 66 }

</bundles_post_ra>
